<compile_context>
chip_gen: v7x
topology: tpu7x:2x2x1
jax: 0.10.0
libtpu: 0.0.40
codegen_flags: <defaults>
</compile_context>

<pallas_src>
import jax
import jax.numpy as jnp
from jax.experimental import pallas as pl
from jax.experimental.pallas import tpu as pltpu

# Lane-dense batch tile (elements along the lane axis). Keeps the DMA pipeline
# full on large B while staying tiny vs. VMEM (2*TILE_B*4 B in + TILE_B*4 B out,
# double-buffered ≈ 0.75 MiB at 32768) — safe even on v7x's 64 MiB VMEM.
_MAX_TILE_B = 32768
_LANE = 128


def _round_up(n, m):
    return ((n + m - 1) // m) * m


def _position_kernel(params_ref, x_ref, o_ref):
    # params_ref: SMEM (3,) = [w0, w1, b]
    # x_ref:      VMEM (2, TILE_B)  -- batch on the lane axis
    # o_ref:      VMEM (1, TILE_B)
    w0 = params_ref[0]
    w1 = params_ref[1]
    b = params_ref[2]
    x0 = x_ref[0:1, :]                      # (1, TILE_B)
    x1 = x_ref[1:2, :]                      # (1, TILE_B)
    y = w0 * x0 + w1 * x1 + b               # pure VPU work, scalar broadcast
    o_ref[...] = jnp.maximum(y, 0.0)        # ReLU


def position_model_forward(x, weight, bias):
    """x: (B, 2) float32; weight: (1, 2) (torch out x in); bias: (1,). Returns (B, 1)."""
    x = x.astype(jnp.float32)
    B, f_in = x.shape
    assert f_in == 2 and weight.shape == (1, 2) and bias.shape == (1,)

    # Batch on the lane axis.
    x_t = x.T                                             # (2, B)

    # Lane-dense tiling: pad B to a full multiple of the tile (>=128 lanes) so
    # every block, including the last, is an unmasked full-width store.
    tile_b = min(_round_up(B, _LANE), _MAX_TILE_B)
    b_pad = _round_up(B, tile_b)
    if b_pad != B:
        x_t = jnp.pad(x_t, ((0, 0), (0, b_pad - B)))

    # Scalar parameter table for SMEM: [w0, w1, b].
    params = jnp.concatenate(
        [weight.reshape(-1).astype(jnp.float32),
         bias.reshape(-1).astype(jnp.float32)])           # (3,)

    out_t = pl.pallas_call(
        _position_kernel,
        out_shape=jax.ShapeDtypeStruct((1, b_pad), jnp.float32),
        grid_spec=pl.GridSpec(
            grid=(b_pad // tile_b,),
            in_specs=[
                pl.BlockSpec(memory_space=pltpu.MemorySpace.SMEM),   # params
                pl.BlockSpec((2, tile_b), lambda i: (0, i)),         # x (2, B_pad)
            ],
            out_specs=pl.BlockSpec((1, tile_b), lambda i: (0, i)),
        ),
        compiler_params=pltpu.CompilerParams(
            dimension_semantics=("parallel",)),
    )(params, x_t)

    # Drop batch padding and return in torch layout (B, 1).
    return out_t[:, :B].T


if __name__ == "__main__":
    key = jax.random.PRNGKey(0)
    kx, kw, kb = jax.random.split(key, 3)

    B = 8
    # Deterministic synthetic parameters matching nn.Linear(2, 1) shapes.
    weight = jax.random.uniform(kw, (1, 2), jnp.float32, -0.5, 0.5)  # (out, in)
    bias = jax.random.uniform(kb, (1,), jnp.float32, -0.5, 0.5)
    x = jax.random.normal(kx, (B, 2), jnp.float32)

    out = position_model_forward(x, weight, bias)
    out = jax.block_until_ready(out)

    # Reference: same math as torch — relu(x @ W^T + b).
    ref = jnp.maximum(x @ weight.T + bias, 0.0)
    assert out.shape == (B, 1)
    assert jnp.allclose(out, ref, atol=1e-5), (out, ref)

    print("KERNEL_OK")
</pallas_src>

<mosaic_0001>
module attributes {stable_mosaic.version = 11 : i64} {
  func.func @_position_kernel(%arg0: i32, %arg1: memref<3xf32, #tpu.memory_space<smem>>, %arg2: memref<2x128xf32, #tpu.memory_space<vmem>>, %arg3: memref<1x128xf32, #tpu.memory_space<vmem>>) attributes {dimension_semantics = [#tpu.dimension_semantics<parallel>], iteration_bounds = array<i64: 1>, scalar_prefetch = 0 : i64, scratch_operands = 0 : i64, tpu.core_type = #tpu.core_type<tc>, window_params = [{transform_indices = @transform_0, window_bounds = array<i64: 3>}, {transform_indices = @transform_1, window_bounds = array<i64: 2, 128>}, {transform_indices = @transform_2, window_bounds = array<i64: 1, 128>}]} {
    %c0 = arith.constant 0 : index
    %0 = memref.load %arg1[%c0] : memref<3xf32, #tpu.memory_space<smem>>
    %c1 = arith.constant 1 : index
    %1 = memref.load %arg1[%c1] : memref<3xf32, #tpu.memory_space<smem>>
    %c2 = arith.constant 2 : index
    %2 = memref.load %arg1[%c2] : memref<3xf32, #tpu.memory_space<smem>>
    %c0_0 = arith.constant 0 : index
    %c0_1 = arith.constant 0 : index
    %3 = vector.load %arg2[%c0_0, %c0_1] : memref<2x128xf32, #tpu.memory_space<vmem>>, vector<1x128xf32>
    %c1_2 = arith.constant 1 : index
    %c0_3 = arith.constant 0 : index
    %4 = vector.load %arg2[%c1_2, %c0_3] : memref<2x128xf32, #tpu.memory_space<vmem>>, vector<1x128xf32>
    %5 = vector.broadcast %0 : f32 to vector<1x128xf32>
    %6 = arith.mulf %5, %3 : vector<1x128xf32>
    %7 = vector.broadcast %1 : f32 to vector<1x128xf32>
    %8 = arith.mulf %7, %4 : vector<1x128xf32>
    %9 = arith.addf %6, %8 : vector<1x128xf32>
    %10 = vector.broadcast %2 : f32 to vector<1x128xf32>
    %11 = arith.addf %9, %10 : vector<1x128xf32>
    %cst = arith.constant 0.000000e+00 : f32
    %12 = vector.broadcast %cst : f32 to vector<1x128xf32>
    %13 = arith.maximumf %11, %12 : vector<1x128xf32>
    %c0_4 = arith.constant 0 : index
    %c0_5 = arith.constant 0 : index
    %14 = vector.load %arg3[%c0_4, %c0_5] : memref<1x128xf32, #tpu.memory_space<vmem>>, vector<1x128xf32>
    tpu.vector_store %arg3[%c0_4, %c0_5], %13 {strides = array<i32>} : memref<1x128xf32, #tpu.memory_space<vmem>>, vector<1x128xf32>,
    return
  }
  func.func @transform_0(%arg0: i32) -> i32 {
    %c0_i32 = arith.constant 0 : i32
    %c0_i32_0 = arith.constant 0 : i32
    return %c0_i32 : i32
  }
  func.func @transform_1(%arg0: i32) -> (i32, i32) {
    %c0_i32 = arith.constant 0 : i32
    %c0_i32_0 = arith.constant 0 : i32
    return %c0_i32, %arg0 : i32, i32
  }
  func.func @transform_2(%arg0: i32) -> (i32, i32) {
    %c0_i32 = arith.constant 0 : i32
    %c0_i32_0 = arith.constant 0 : i32
    return %c0_i32, %arg0 : i32, i32
  }
}

</mosaic_0001>

<bundles_post_ra>
// kernel: tpu_custom_call.1
= control target key start
LH: loop header
LB: loop body
LE: loop exit
PB: predicated region body
PF: predicated region fallthrough
CT: control target
= control target key end

     0   :  { %7 = vsyncpa [#allocation4], 0  ;;  %s139_s0 = inlined_call_operand.hbm [shape: f32[3], index: 0, kind: input, shape index: {}]   ;;  %s140_s1 = inlined_call_operand.vmem [shape: f32[2,128], index: 1, kind: input, shape index: {}]   ;;  %s141_s2 = inlined_call_operand.hbm [shape: f32[1,128], index: 2, kind: output, shape index: {}]  }
   0x1   :  { %8 = vsyncpa [#allocation3], 0  ;;  %s56_s11 = scalar_lea.hbm %s139_s0, 16 }
   0x2   :  { %p57_p0 = scmp.ne.s32.totalorder %s139_s0, %s56_s11  ;;  %p60_p1 = scmp.lt.u32.totalorder %s56_s11, %s139_s0 }
   0x4   :  { %p62_p2 = pnand %p60_p1, %p57_p0 }
   0x6   :  { %65 = shalt.err (!%p62_p2)
}
   0x7   :  { %s92_s16 = smov [#allocation2]  }
   0x8   :  { %16 = dma.hbm_to_smem %s139_s0, 16, %s92_s16, [#allocation4]  }
   0x9   :  { %88 = dma.done.wait [#allocation4], 16  }
   0xa   :  { %89 = vsyncadd [#allocation4], 4294967280 }
   0xb   :  { %22 = sfence }
   0xc   :  { %s23_s19 = sld [smem:[#allocation2]]  ;;  %s52_s20 = sld [smem:[#allocation2 + $0x1]]  ;;  %v26_v0 = vld [vmem:[%s140_s1] sm:$0x1]  ;;  %v27_v1 = vld [vmem:[%s140_s1 + $0x1] sm:$0x1] }
   0xd   :  { %s53_s21 = sld [smem:[#allocation2 + $0x2]]  ;;  %s93_s0 = smov [#allocation5]  }
   0xe   :  { %s43_s26 = sshll.u32 %s93_s0, 4  ;;  %s44_s26 = int_to_ptr.vmem [resolvable:$true] %s43_s26 }
   0xf   :  { %s66_s27 = scalar_lea.vmem %s44_s26, 16  ;;  %s70_s28 = scalar_lea.vmem %s44_s26, 32 }
  0x10   :  { %p67_p3 = scmp.ne.s32.totalorder %s44_s26, %s66_s27  ;;  %p71_p4 = scmp.lt.s32.totalorder %s44_s26, %s44_s26 }
  0x11   :  { %p72_p5 = scmp.lt.s32.totalorder %s70_s28, %s66_s27 }
  0x12   :  { %v28_v2 = vstv %s23_s19  ;;  %v30_v3 = vstv %s52_s20 }
  0x13   :  { %v29_v4 = vmul.f32 %v28_v2, %v26_v0  ;;  %v31_v5 = vmul.f32 %v30_v3, %v27_v1  ;;  %v33_v6 = vstv %s53_s21  ;;  %p73_p6 = por %p72_p5, %p71_p4 }
  0x15   :  { %v32_v7 = vadd.f32 %v31_v5, %v29_v4  ;;  %p74_p7 = pnand %p73_p6, %p67_p3 }
  0x17   :  { %v34_v8 = vadd.f32 %v33_v6, %v32_v7 }
  0x19   :  { %v35_v9 = vmax.f32 %v34_v8, 0.0 }
  0x1b   :  { %36 = vst [vmem:[#allocation5] sm:$0x1] %v35_v9 }
  0x1c   :  { %77 = shalt.err (!%p74_p7)
}
  0x1d   :  { %s78_s30 = scalar_lea.hbm %s141_s2, 16 }
  0x1e   :  { %p79_p8 = scmp.ne.s32.totalorder %s141_s2, %s78_s30  ;;  %p82_p9 = scmp.lt.u32.totalorder %s78_s30, %s141_s2 }
  0x20   :  { %p84_p10 = pnand %p82_p9, %p79_p8 }
  0x22   :  { %87 = shalt.err (!%p84_p10)
}
  0x23   :  { %46 = dma.vmem_to_hbm [thread:$0]  %s44_s26, 16, %s141_s2, [#allocation3]  }
  0x24   :  { %90 = dma.done.wait [#allocation3], 16  }
  0x25   :  { %91 = vsyncadd [#allocation3], 4294967280 }
  0x26   :  { %50 = vsyncpa [#allocation3], 1 }
  0x27   :  { %51 = vsyncpa [#allocation4], 1 }

</bundles_post_ra>
